<compile_context>
chip_gen: v7x
topology: tpu7x:2x2x1
jax: 0.10.0
libtpu: 0.0.40
codegen_flags: <defaults>
</compile_context>

<pallas_src>
import jax
import jax.numpy as jnp
from jax.experimental import pallas as pl
from jax.experimental.pallas import tpu as pltpu

EPS = 1e-8
LANE = 128
SUBLANE = 8  # f32 sublane granularity; scaled per dtype in _choose_tiles


def _round_up(x: int, m: int) -> int:
    return ((x + m - 1) // m) * m


def _round_down(x: int, m: int) -> int:
    return (x // m) * m


def _vmem_budget():
    """Per-input per-block byte target and scoped VMEM limit (generation aware)."""
    cap = 128 * 1024 * 1024
    try:
        info = pltpu.get_tpu_info()
        cap = int(getattr(info, "vmem_capacity_bytes", cap)) or cap
    except Exception:
        pass
    vmem_limit = min(cap // 2, 48 * 1024 * 1024)      # 48 MiB v5e/v6e, 32 MiB v7x
    block_bytes = max(512 * 1024, vmem_limit // 12)   # ~4 MiB v5e/v6e, ~2.7 MiB v7x
    return block_bytes, vmem_limit


def _choose_tiles(R: int, D: int, itemsize: int, block_bytes: int):
    """Pick (tr, tc, nr, nc). nc == 1 means a whole row fits one block."""
    sublane = max(SUBLANE, (SUBLANE * 4) // itemsize)  # 8 f32, 16 bf16, 32 int8/fp8
    row_bytes = D * itemsize
    r_pad = _round_up(R, sublane)

    if row_bytes * sublane <= block_bytes:
        # Whole (native-width) rows fit: tile only over rows, tc = full D.
        tr = _round_down(block_bytes // row_bytes, sublane)
        tr = max(sublane, min(tr, r_pad))
        if R > sublane:
            # Keep >= 2 row blocks so v7x's two TensorCores both get work.
            tr = min(tr, _round_up(pl.cdiv(R, 2), sublane))
        nr = pl.cdiv(R, tr)
        return tr, D, nr, 1

    # Very wide rows: tile over columns too (rare fallback).
    tr = sublane
    tc = _round_down(block_bytes // (sublane * itemsize), LANE)
    tc = max(LANE, min(tc, _round_up(D, LANE)))
    nr = pl.cdiv(R, tr)
    nc = pl.cdiv(D, tc)
    return tr, tc, nr, nc


def _make_single_block_kernel(num_valid_rows: int, tr: int):
    """nc == 1: whole row per block -> no scratch, no pl.when phases."""

    def kernel(p_ref, t_ref, out_ref):
        i = pl.program_id(0)  # row block ("parallel")

        p = p_ref[...].astype(jnp.float32)
        t = t_ref[...].astype(jnp.float32)

        dot = jnp.sum(p * t, axis=-1, keepdims=True)   # (tr, 1)
        pp = jnp.sum(p * p, axis=-1, keepdims=True)
        tt = jnp.sum(t * t, axis=-1, keepdims=True)

        denom = jnp.maximum(jnp.sqrt(pp) * jnp.sqrt(tt), EPS)
        cos = dot / denom

        # Mask rows that only exist because of the partial last row block.
        row_ids = i * tr + jax.lax.broadcasted_iota(jnp.int32, (tr, 1), 0)
        loss_rows = jnp.where(row_ids < num_valid_rows, 1.0 - cos, 0.0)

        block_sum = jnp.sum(loss_rows, axis=0, keepdims=True)        # (1, 1)
        out_ref[...] = jnp.broadcast_to(block_sum, out_ref.shape)    # (8, 128) slab

    return kernel


def _make_multi_block_kernel(num_valid_rows: int, D: int, tr: int, tc: int):
    """nc > 1 (very wide rows): column reduction with per-row VMEM accumulators."""

    def kernel(p_ref, t_ref, out_ref, dot_acc, pp_acc, tt_acc):
        i = pl.program_id(0)  # row block    ("parallel")
        j = pl.program_id(1)  # column block ("arbitrary", reduction)

        @pl.when(j == 0)
        def _():
            dot_acc[...] = jnp.zeros_like(dot_acc)
            pp_acc[...] = jnp.zeros_like(pp_acc)
            tt_acc[...] = jnp.zeros_like(tt_acc)

        p = p_ref[...].astype(jnp.float32)
        t = t_ref[...].astype(jnp.float32)

        # Mask out-of-range columns of the last column block BEFORE the
        # products so garbage lanes cannot contaminate valid rows.
        col = j * tc + jax.lax.broadcasted_iota(jnp.int32, (tr, tc), 1)
        valid = col < D
        p = jnp.where(valid, p, 0.0)
        t = jnp.where(valid, t, 0.0)

        dot_acc[...] += jnp.sum(p * t, axis=-1, keepdims=True)
        pp_acc[...] += jnp.sum(p * p, axis=-1, keepdims=True)
        tt_acc[...] += jnp.sum(t * t, axis=-1, keepdims=True)

        @pl.when(j == pl.num_programs(1) - 1)
        def _():
            denom = jnp.maximum(jnp.sqrt(pp_acc[...]) * jnp.sqrt(tt_acc[...]), EPS)
            cos = dot_acc[...] / denom
            row_ids = i * tr + jax.lax.broadcasted_iota(jnp.int32, (tr, 1), 0)
            loss_rows = jnp.where(row_ids < num_valid_rows, 1.0 - cos, 0.0)
            block_sum = jnp.sum(loss_rows, axis=0, keepdims=True)
            out_ref[...] = jnp.broadcast_to(block_sum, out_ref.shape)

    return kernel


def cosine_similarity_loss(pred: jax.Array, target: jax.Array) -> jax.Array:
    """mean(1 - cosine_similarity(pred.view(-1,H*W), target.view(-1,H*W), dim=1))."""
    assert pred.shape == target.shape and pred.ndim == 4
    assert pred.dtype == target.dtype
    N, C, H, W = pred.shape
    R, D = N * C, H * W

    # Free contiguous reshape; keep native dtype (upcast happens in-kernel).
    p2 = pred.reshape(R, D)
    t2 = target.reshape(R, D)
    itemsize = p2.dtype.itemsize

    block_bytes, vmem_limit = _vmem_budget()
    tr, tc, nr, nc = _choose_tiles(R, D, itemsize, block_bytes)

    out_rows = nr * SUBLANE
    cost = pl.CostEstimate(
        flops=6 * R * D,
        bytes_accessed=2 * R * D * itemsize + out_rows * LANE * 4,
        transcendentals=0,
    )

    if nc == 1:
        kernel = _make_single_block_kernel(R, tr)
        grid = (nr,)
        in_specs = [
            pl.BlockSpec((tr, D), lambda i: (i, 0)),
            pl.BlockSpec((tr, D), lambda i: (i, 0)),
        ]
        out_specs = pl.BlockSpec((SUBLANE, LANE), lambda i: (i, 0))
        scratch = []
        dims = ("parallel",)
    else:
        kernel = _make_multi_block_kernel(R, D, tr, tc)
        grid = (nr, nc)
        in_specs = [
            pl.BlockSpec((tr, tc), lambda i, j: (i, j)),
            pl.BlockSpec((tr, tc), lambda i, j: (i, j)),
        ]
        out_specs = pl.BlockSpec((SUBLANE, LANE), lambda i, j: (i, 0))
        scratch = [pltpu.VMEM((tr, 1), jnp.float32)] * 3
        dims = ("parallel", "arbitrary")

    partials = pl.pallas_call(
        kernel,
        out_shape=jax.ShapeDtypeStruct((out_rows, LANE), jnp.float32),
        grid_spec=pltpu.PrefetchScalarGridSpec(
            num_scalar_prefetch=0,
            grid=grid,
            in_specs=in_specs,
            out_specs=out_specs,
            scratch_shapes=scratch,
        ),
        compiler_params=pltpu.CompilerParams(
            dimension_semantics=dims,
            vmem_limit_bytes=vmem_limit,
        ),
        cost_estimate=cost,
    )(p2, t2)

    # One scalar per row block (broadcast over its lane-dense slab); tiny combine in JAX.
    block_sums = partials.reshape(nr, SUBLANE, LANE)[:, 0, 0]
    return jnp.sum(block_sums) / jnp.float32(R)


def cosine_similarity_loss_ref(pred, target, eps=EPS):
    N, C, H, W = pred.shape
    p = pred.reshape(-1, H * W).astype(jnp.float32)
    t = target.reshape(-1, H * W).astype(jnp.float32)
    dot = jnp.sum(p * t, axis=1)
    denom = jnp.maximum(
        jnp.sqrt(jnp.sum(p * p, axis=1)) * jnp.sqrt(jnp.sum(t * t, axis=1)), eps
    )
    cos = dot / denom
    return jnp.mean(1.0 - cos)


if __name__ == "__main__":
    key = jax.random.PRNGKey(0)
    k1, k2 = jax.random.split(key)
    shape = (2, 4, 16, 16)  # N, C, H, W
    pred = jax.random.normal(k1, shape, dtype=jnp.float32)
    target = jax.random.normal(k2, shape, dtype=jnp.float32)

    out = jax.block_until_ready(cosine_similarity_loss(pred, target))
    ref = cosine_similarity_loss_ref(pred, target)
    assert jnp.allclose(out, ref, rtol=1e-5, atol=1e-5), (out, ref)

    print("KERNEL_OK")
</pallas_src>

<mosaic_0001>
module attributes {stable_mosaic.version = 11 : i64} {
  func.func @kernel(%arg0: i32, %arg1: memref<8x256xf32, #tpu.memory_space<vmem>>, %arg2: memref<8x256xf32, #tpu.memory_space<vmem>>, %arg3: memref<8x128xf32, #tpu.memory_space<vmem>>) attributes {dimension_semantics = [#tpu.dimension_semantics<parallel>], iteration_bounds = array<i64: 1>, scalar_prefetch = 0 : i64, scratch_operands = 0 : i64, tpu.core_type = #tpu.core_type<tc>, window_params = [{transform_indices = @transform_0, window_bounds = array<i64: 8, 256>}, {transform_indices = @transform_1, window_bounds = array<i64: 8, 256>}, {transform_indices = @transform_2, window_bounds = array<i64: 8, 128>}]} {
    %c0 = arith.constant 0 : index
    %c0_0 = arith.constant 0 : index
    %0 = vector.load %arg1[%c0, %c0_0] : memref<8x256xf32, #tpu.memory_space<vmem>>, vector<8x256xf32>
    %c0_1 = arith.constant 0 : index
    %c0_2 = arith.constant 0 : index
    %1 = vector.load %arg2[%c0_1, %c0_2] : memref<8x256xf32, #tpu.memory_space<vmem>>, vector<8x256xf32>
    %2 = arith.mulf %0, %1 : vector<8x256xf32>
    %cst = arith.constant dense<0.000000e+00> : vector<8xf32>
    %3 = vector.multi_reduction <add>, %2, %cst [1] : vector<8x256xf32> to vector<8xf32>
    %4 = vector.shape_cast %3 : vector<8xf32> to vector<8x1xf32>
    %5 = arith.mulf %0, %0 : vector<8x256xf32>
    %cst_3 = arith.constant dense<0.000000e+00> : vector<8xf32>
    %6 = vector.multi_reduction <add>, %5, %cst_3 [1] : vector<8x256xf32> to vector<8xf32>
    %7 = vector.shape_cast %6 : vector<8xf32> to vector<8x1xf32>
    %8 = arith.mulf %1, %1 : vector<8x256xf32>
    %cst_4 = arith.constant dense<0.000000e+00> : vector<8xf32>
    %9 = vector.multi_reduction <add>, %8, %cst_4 [1] : vector<8x256xf32> to vector<8xf32>
    %10 = vector.shape_cast %9 : vector<8xf32> to vector<8x1xf32>
    %11 = math.sqrt %7 : vector<8x1xf32>
    %12 = math.sqrt %10 : vector<8x1xf32>
    %13 = arith.mulf %11, %12 : vector<8x1xf32>
    %cst_5 = arith.constant 9.99999993E-9 : f32
    %14 = vector.broadcast %cst_5 : f32 to vector<8x1xf32>
    %15 = arith.maximumf %13, %14 : vector<8x1xf32>
    %16 = arith.divf %4, %15 : vector<8x1xf32>
    %c8_i32 = arith.constant 8 : i32
    %17 = arith.muli %arg0, %c8_i32 : i32
    %18 = tpu.iota {dimensions = array<i32: 0>} : vector<8x1xi32>
    %19 = vector.broadcast %17 : i32 to vector<8x1xi32>
    %20 = arith.addi %19, %18 : vector<8x1xi32>
    %c8_i32_6 = arith.constant 8 : i32
    %21 = vector.broadcast %c8_i32_6 : i32 to vector<8x1xi32>
    %22 = arith.cmpi slt, %20, %21 : vector<8x1xi32>
    %cst_7 = arith.constant 1.000000e+00 : f32
    %23 = vector.broadcast %cst_7 : f32 to vector<8x1xf32>
    %24 = arith.subf %23, %16 : vector<8x1xf32>
    %cst_8 = arith.constant 0.000000e+00 : f32
    %25 = vector.broadcast %cst_8 : f32 to vector<8x1xf32>
    %26 = arith.select %22, %24, %25 : vector<8x1xi1>, vector<8x1xf32>
    %cst_9 = arith.constant dense<0.000000e+00> : vector<1xf32>
    %27 = vector.multi_reduction <add>, %26, %cst_9 [0] : vector<8x1xf32> to vector<1xf32>
    %28 = vector.shape_cast %27 : vector<1xf32> to vector<1x1xf32>
    %29 = vector.shape_cast %28 : vector<1x1xf32> to vector<1x1xf32>
    %30 = vector.broadcast %29 : vector<1x1xf32> to vector<8x128xf32>
    %c0_10 = arith.constant 0 : index
    %c0_11 = arith.constant 0 : index
    %31 = vector.load %arg3[%c0_10, %c0_11] : memref<8x128xf32, #tpu.memory_space<vmem>>, vector<8x128xf32>
    tpu.vector_store %arg3[%c0_10, %c0_11], %30 {strides = array<i32>} : memref<8x128xf32, #tpu.memory_space<vmem>>, vector<8x128xf32>,
    return
  }
  func.func @transform_0(%arg0: i32) -> (i32, i32) {
    %c0_i32 = arith.constant 0 : i32
    %c0_i32_0 = arith.constant 0 : i32
    return %arg0, %c0_i32 : i32, i32
  }
  func.func @transform_1(%arg0: i32) -> (i32, i32) {
    %c0_i32 = arith.constant 0 : i32
    %c0_i32_0 = arith.constant 0 : i32
    return %arg0, %c0_i32 : i32, i32
  }
  func.func @transform_2(%arg0: i32) -> (i32, i32) {
    %c0_i32 = arith.constant 0 : i32
    %c0_i32_0 = arith.constant 0 : i32
    return %arg0, %c0_i32 : i32, i32
  }
}

</mosaic_0001>

<bundles_post_ra>
// kernel: tpu_custom_call.1
= control target key start
LH: loop header
LB: loop body
LE: loop exit
PB: predicated region body
PF: predicated region fallthrough
CT: control target
= control target key end

     0   :  { %7 = vsyncpa [#allocation3], 0  ;;  %s239_s0 = inlined_call_operand.hbm [shape: f32[8,256], index: 0, kind: input, shape index: {}]   ;;  %s240_s1 = inlined_call_operand.hbm [shape: f32[8,256], index: 1, kind: input, shape index: {}]   ;;  %s241_s2 = inlined_call_operand.hbm [shape: f32[8,128], index: 2, kind: output, shape index: {}]  }
   0x1   :  { %8 = vsyncpa [#allocation6], 0 }
   0x2   :  { %9 = vsyncpa [#allocation4], 0  ;;  %s185_s9 = smov [#allocation2]   ;;  %s186_s11 = smov [#allocation5]  }
   0x3   :  { %s16_s10 = sshll.u32 %s185_s9, 4  ;;  %s26_s12 = sshll.u32 %s186_s11, 4  ;;  %s17_s10 = int_to_ptr.vmem [resolvable:$true] %s16_s10  ;;  %s27_s12 = int_to_ptr.vmem [resolvable:$true] %s26_s12 }
   0x4   :  { %s113_s15 = scalar_lea.hbm %s239_s0, 256 }
   0x5   :  { %p114_p0 = scmp.ne.s32.totalorder %s239_s0, %s113_s15  ;;  %p117_p1 = scmp.lt.u32.totalorder %s113_s15, %s239_s0 }
   0x7   :  { %p119_p2 = pnand %p117_p1, %p114_p0 }
   0x9   :  { %122 = shalt.err (!%p119_p2)
}
   0xa   :  { %s123_s20 = scalar_lea.vmem %s17_s10, 256  ;;  %p128_p4 = scmp.lt.s32.totalorder %s17_s10, %s17_s10 }
   0xb   :  { %p124_p3 = scmp.ne.s32.totalorder %s17_s10, %s123_s20  ;;  %p129_p5 = scmp.lt.s32.totalorder %s123_s20, %s123_s20 }
   0xd   :  { %p130_p6 = por %p129_p5, %p128_p4 }
   0xf   :  { %p131_p7 = pnand %p130_p6, %p124_p3 }
  0x11   :  { %134 = shalt.err (!%p131_p7)
}
  0x12   :  { %19 = dma.hbm_to_vmem [thread:$0]  %s239_s0, 256, %s17_s10, [#allocation3]  }
  0x13   :  { %s135_s25 = scalar_lea.hbm %s240_s1, 256 }
  0x14   :  { %p136_p8 = scmp.ne.s32.totalorder %s240_s1, %s135_s25  ;;  %p139_p9 = scmp.lt.u32.totalorder %s135_s25, %s240_s1 }
  0x16   :  { %p141_p10 = pnand %p139_p9, %p136_p8 }
  0x18   :  { %144 = shalt.err (!%p141_p10)
}
  0x19   :  { %s145_s30 = scalar_lea.vmem %s27_s12, 256  ;;  %p150_p12 = scmp.lt.s32.totalorder %s27_s12, %s27_s12 }
  0x1a   :  { %p146_p11 = scmp.ne.s32.totalorder %s27_s12, %s145_s30  ;;  %p151_p13 = scmp.lt.s32.totalorder %s145_s30, %s145_s30 }
  0x1c   :  { %p152_p0 = por %p151_p13, %p150_p12 }
  0x1e   :  { %p153_p1 = pnand %p152_p0, %p146_p11 }
  0x20   :  { %156 = shalt.err (!%p153_p1)
}
  0x21   :  { %29 = dma.hbm_to_vmem [thread:$0]  %s240_s1, 256, %s27_s12, [#allocation6]  }
  0x22   :  { %179 = dma.done.wait [#allocation3], 256  }
  0x23   :  { %180 = vsyncadd [#allocation3], 4294967040 }
  0x24   :  { %181 = dma.done.wait [#allocation6], 256  }
  0x25   :  { %182 = vsyncadd [#allocation6], 4294967040  ;;  %v36_v0 = vld [vmem:[#allocation2] sm:$0xff]  ;;  %v37_v1 = vld [vmem:[#allocation2 + $0x8] sm:$0xff]  ;;  %s187_s1 = smov [#allocation7]  }
  0x26   :  { %v38_v2 = vld [vmem:[#allocation5] sm:$0xff]  ;;  %v45_v3 = vmul.f32 %v36_v0, %v36_v0  ;;  %v46_v4 = vmul.f32 %v37_v1, %v37_v1  ;;  %v39_v5 = vld [vmem:[#allocation5 + $0x8] sm:$0xff]  ;;  %s94_s4 = sshll.u32 %s187_s1, 4  ;;  %s95_s4 = int_to_ptr.vmem [resolvable:$true] %s94_s4 }
  0x27   :  { %v50_v6 = vmul.f32 %v38_v2, %v38_v2  ;;  %v40_v7 = vmul.f32 %v38_v2, %v36_v0  ;;  %v51_v8 = vmul.f32 %v39_v5, %v39_v5  ;;  %v41_v9 = vmul.f32 %v39_v5, %v37_v1  ;;  %s157_s5 = scalar_lea.vmem %s95_s4, 128  ;;  %p162_p3 = scmp.lt.s32.totalorder %s95_s4, %s95_s4 }
  0x28   :  { %v47_v10 = vadd.f32 %v46_v4, %v45_v3  ;;  %p158_p2 = scmp.ne.s32.totalorder %s95_s4, %s157_s5  ;;  %p163_p4 = scmp.lt.s32.totalorder %s157_s5, %s157_s5 }
  0x29   :  { %v42_v11 = vadd.f32 %v41_v9, %v40_v7  ;;  %v52_v12 = vadd.f32 %v51_v8, %v50_v6 }
  0x2a   :  { %48 = vadd.xlane.f32.xlu0 %v47_v10  ;;  %p164_p5 = por %p163_p4, %p162_p3 }
  0x2b   :  { %43 = vadd.xlane.f32.xlu1 %v42_v11 }
  0x2c   :  { %p165_p6 = pnand %p164_p5, %p158_p2 }
  0x2e   :  { %53 = vadd.xlane.f32.xlu0 %v52_v12 }
  0xb7   :  { %v49_v13 = vpop.xlane.xlu0 %48 }
  0xb8   :  { %107 = vrsqrt.f32 %v49_v13  ;;  %vm57_vm0 = vcmp.eq.f32.partialorder %v49_v13, inf  ;;  %v60_v20 = vand.u32 2147483648, %v49_v13  ;;  %vm59_vm2 = vcmp.eq.f32.partialorder %v49_v13, 0.0  ;;  %v44_v27 = vpop.xlane.xlu1 %43 }
  0xbb   :  { %v54_v14 = vpop.xlane.xlu0 %53 }
  0xbc   :  { %109 = vrsqrt.f32 %v54_v14  ;;  %vm64_vm1 = vcmp.eq.f32.partialorder %v54_v14, inf  ;;  %v67_v21 = vand.u32 2147483648, %v54_v14  ;;  %vm66_vm3 = vcmp.eq.f32.partialorder %v54_v14, 0.0 }
  0xc2   :  { %v108_v15 = vpop.eup %107 }
  0xc3   :  { %v56_v16 = vmul.f32 %v108_v15, %v49_v13 }
  0xc5   :  { %v58_v18 = vsel %vm57_vm0, %v49_v13, %v56_v16 }
  0xc6   :  { %v110_v17 = vpop.eup %109  ;;  %v61_v23 = vsel %vm59_vm2, %v60_v20, %v58_v18 }
  0xc7   :  { %v63_v19 = vmul.f32 %v110_v17, %v54_v14 }
  0xc9   :  { %v65_v22 = vsel %vm64_vm1, %v54_v14, %v63_v19 }
  0xca   :  { %v68_v24 = vsel %vm66_vm3, %v67_v21, %v65_v22 }
  0xcb   :  { %v69_v25 = vmul.f32 %v68_v24, %v61_v23 }
  0xcd   :  { %v70_v26 = vmax.f32 %v69_v25, 1e-08 }
  0xcf   :  { %111 = vrcp.f32 %v70_v26 }
  0xd9   :  { %v112_v28 = vpop.eup %111 }
  0xda   :  { %v72_v29 = vmul.f32 %v112_v28, %v44_v27 }
  0xdc   :  { %v79_v30 = vsub.f32 1.0, %v72_v29 }
  0xde   :  { %v81_v31 = vrot.slane %v79_v30, 4 }
  0xe0   :  { %v82_v32 = vadd.f32 %v81_v31, %v79_v30 }
  0xe2   :  { %v83_v33 = vrot.slane %v82_v32, 2 }
  0xe4   :  { %v84_v34 = vadd.f32 %v83_v33, %v82_v32 }
  0xe6   :  { %v85_v35 = vrot.slane %v84_v34, 1 }
  0xe8   :  { %v86_v36 = vadd.f32 %v85_v35, %v84_v34 }
  0xea   :  { %87 = vst [vmem:[#allocation7] sm:$0xff] %v86_v36 }
  0xeb   :  { %168 = shalt.err (!%p165_p6)
}
  0xec   :  { %s169_s8 = scalar_lea.hbm %s241_s2, 128 }
  0xed   :  { %p170_p7 = scmp.ne.s32.totalorder %s241_s2, %s169_s8  ;;  %p173_p8 = scmp.lt.u32.totalorder %s169_s8, %s241_s2 }
  0xef   :  { %p175_p9 = pnand %p173_p8, %p170_p7 }
  0xf1   :  { %178 = shalt.err (!%p175_p9)
}
  0xf2   :  { %97 = dma.vmem_to_hbm [thread:$0]  %s95_s4, 128, %s241_s2, [#allocation4]  }
  0xf3   :  { %183 = dma.done.wait [#allocation4], 128  }
  0xf4   :  { %184 = vsyncadd [#allocation4], 4294967168 }
  0xf5   :  { %101 = vsyncpa [#allocation3], 1 }
  0xf6   :  { %102 = vsyncpa [#allocation6], 1 }
  0xf7   :  { %103 = vsyncpa [#allocation4], 1 }

</bundles_post_ra>
